<compile_context>
chip_gen: v5e
topology: v5e:2x2
jax: 0.10.0
libtpu: 0.0.40
codegen_flags: <defaults>
</compile_context>

<pallas_src>
import jax
import jax.numpy as jnp
from jax import lax
from jax.experimental import pallas as pl
from jax.experimental.pallas import tpu as pltpu


def _round_up(x, m):
    return ((x + m - 1) // m) * m


def two_tower_kernel(x_ref,
                     w1_ref, b1_ref,
                     w2_ref, b2_ref,
                     wo1c_ref, wo2_ref, bo2_ref,
                     wo3_ref, bo3_ref,
                     out_ref):
    f32 = jnp.float32
    h4, h2 = wo1c_ref.shape            # wo1_c: (hidden//4, hidden//2)

    def mm(x, w_ref):
        # MXU dot in the weight dtype (f32 or bf16), f32 accumulation.
        return jnp.dot(x.astype(w_ref.dtype), w_ref[...],
                       preferred_element_type=f32)

    # fused layer 1: [u|q|c] @ blockdiag(Wu, Wc1) + [bu|bc1] -> [user_vec | h1]
    a1 = jnp.maximum(mm(x_ref[...], w1_ref) + b1_ref[...], 0.0)

    # fused layer 2: [user_vec|h1] @ blockdiag(Wo1_u, Wc2) + [bo1|bc2]
    z2 = mm(a1, w2_ref) + b2_ref[...]
    content_vec = jnp.maximum(z2[:, h2:], 0.0)            # relu(h1 @ Wc2 + bc2)
    o1 = jnp.maximum(z2[:, :h2] + mm(content_vec, wo1c_ref), 0.0)

    # output layer 2
    o2 = jnp.maximum(mm(o1, wo2_ref) + bo2_ref[...], 0.0)

    # output layer 3 (Linear(h4, 1)): lane-dense (1, TB) row via wo3 . o2^T
    row = lax.dot_general(wo3_ref[...], o2.astype(wo3_ref.dtype),
                          dimension_numbers=(((1,), (1,)), ((), ())),
                          preferred_element_type=f32)
    out_ref[0] = row + bo3_ref[...]


def two_tower_forward(params, user_ids, question_emb, concept_emb,
                      compute_dtype=jnp.bfloat16, batch_tile=2048):
    """Runs the TwoTowerModel forward (inference) with one Pallas kernel."""
    f32 = jnp.float32

    # Embedding gather (data-dependent row lookup) stays in plain JAX and feeds
    # directly into the single fused activation slab (no standalone padded temp).
    # TODO(synk): optionally keep user_embedding VMEM-resident and gather rows
    # in-kernel via PrefetchScalarGridSpec(num_scalar_prefetch=1).
    u_emb = params["user_embedding"][user_ids]
    x = jnp.concatenate([u_emb, question_emb, concept_emb],
                        axis=1).astype(compute_dtype)

    B, DX = x.shape
    DU = params["wu"].shape[0]
    H2 = params["wu"].shape[1]
    H4 = params["wc2"].shape[1]

    # fused block-diagonal weights / biases (tiny; built once per call)
    wc1 = jnp.concatenate([params["wc1_q"], params["wc1_c"]], axis=0)
    DQC = wc1.shape[0]
    w1 = jnp.block([[params["wu"], jnp.zeros((DU, H2), f32)],
                    [jnp.zeros((DQC, H2), f32), wc1]])             # (DX, 2*H2)
    b1 = jnp.concatenate([params["bu"], params["bc1"]], axis=1)    # (1, 2*H2)
    w2 = jnp.block([[params["wo1_u"], jnp.zeros((H2, H4), f32)],
                    [jnp.zeros((H2, H2), f32), params["wc2"]]])    # (2*H2, H2+H4)
    b2 = jnp.concatenate([params["bo1"], params["bc2"]], axis=1)   # (1, H2+H4)

    # batch tiling: big tiles (per-grid-step overhead ~0.35us); give the grid at
    # least two steps when the batch allows it (v7x megacore sharding).
    B8 = _round_up(B, 8)
    TB = min(batch_tile, B8)
    if B8 >= 64 and B8 // TB < 2:
        TB = _round_up(pl.cdiv(B8, 2), 32)
    B_pad = _round_up(B, TB)
    if B_pad != B:
        x = jnp.pad(x, ((0, B_pad - B), (0, 0)))
    num_tiles = B_pad // TB

    cast = lambda w: w.astype(compute_dtype)
    operands = (
        x,
        cast(w1), b1.astype(f32),
        cast(w2), b2.astype(f32),
        cast(params["wo1_c"]), cast(params["wo2"]), params["bo2"].astype(f32),
        cast(params["wo3"].reshape(1, H4)),     # row vector, lhs of final dot
        params["bo3"].astype(f32),
    )

    # x streams per batch tile; everything else is VMEM-resident (constant index_map).
    in_specs = ([pl.BlockSpec((TB, DX), lambda i: (i, 0))]
                + [pl.BlockSpec(op.shape, lambda i: (0, 0))
                   for op in operands[1:]])
    out_specs = pl.BlockSpec((1, 1, TB), lambda i: (i, 0, 0))

    flops = 2 * B_pad * (DX * 2 * H2 + 2 * H2 * (H2 + H4) + H4 * H2
                         + H2 * H4 + H4)
    bytes_accessed = (sum(int(op.size) * op.dtype.itemsize for op in operands)
                      + B_pad * 4)

    out = pl.pallas_call(
        two_tower_kernel,
        out_shape=jax.ShapeDtypeStruct((num_tiles, 1, TB), f32),
        grid=(num_tiles,),
        in_specs=in_specs,
        out_specs=out_specs,
        compiler_params=pltpu.CompilerParams(
            dimension_semantics=("parallel",)),
        cost_estimate=pl.CostEstimate(
            flops=flops, transcendentals=0, bytes_accessed=bytes_accessed),
    )(*operands)
    return out.reshape(B_pad)[:B]                       # .squeeze(1)


def init_params(key, num_users, user_emb_dim, question_emb_dim,
                concept_emb_dim, hidden_dim):
    h2 = hidden_dim // 2
    h4 = hidden_dim // 4
    ks = jax.random.split(key, 12)

    def w(k, shape, scale=0.1):
        return (scale * jax.random.normal(k, shape)).astype(jnp.float32)

    return {
        "user_embedding": w(ks[0], (num_users, user_emb_dim), 1.0),
        # user_mlp: Linear(user_emb_dim, h2)   (weights in [in, out] layout)
        "wu": w(ks[1], (user_emb_dim, h2)),
        "bu": w(ks[2], (1, h2)),
        # content_mlp layer 1: Linear(question_emb_dim + concept_emb_dim, h2),
        # stored split along the input dim (== concat of q and c inputs)
        "wc1_q": w(ks[3], (question_emb_dim, h2)),
        "wc1_c": w(ks[4], (concept_emb_dim, h2)),
        "bc1": w(ks[5], (1, h2)),
        # content_mlp layer 2: Linear(h2, h4)
        "wc2": w(ks[6], (h2, h4)),
        "bc2": w(ks[7], (1, h4)),
        # output layer 1: Linear(3*hidden//4, h2) split (user h2 / content h4)
        "wo1_u": w(ks[8], (h2, h2)),
        "wo1_c": w(ks[9], (h4, h2)),
        "bo1": w(ks[10], (1, h2)),
        # output layer 2: Linear(h2, h4)
        "wo2": w(ks[11], (h2, h4)),
        "bo2": jnp.zeros((1, h4), jnp.float32),
        # output layer 3: Linear(h4, 1)
        "wo3": jnp.full((h4, 1), 0.05, jnp.float32),
        "bo3": jnp.full((1, 1), 0.01, jnp.float32),
    }


def reference_forward(params, user_ids, question_emb, concept_emb):
    """Pure-JAX reference (mirrors the PyTorch forward at inference)."""
    relu = lambda x: jnp.maximum(x, 0.0)
    u_emb = params["user_embedding"][user_ids]
    user_vec = relu(u_emb @ params["wu"] + params["bu"])
    content_input = jnp.concatenate([question_emb, concept_emb], axis=1)
    wc1 = jnp.concatenate([params["wc1_q"], params["wc1_c"]], axis=0)
    h1 = relu(content_input @ wc1 + params["bc1"])
    content_vec = relu(h1 @ params["wc2"] + params["bc2"])
    combined = jnp.concatenate([user_vec, content_vec], axis=1)
    wo1 = jnp.concatenate([params["wo1_u"], params["wo1_c"]], axis=0)
    o1 = relu(combined @ wo1 + params["bo1"])
    o2 = relu(o1 @ params["wo2"] + params["bo2"])
    return (o2 @ params["wo3"] + params["bo3"])[:, 0]


if __name__ == "__main__":
    # small, forward-consistent shapes
    num_users = 10
    user_emb_dim = 16
    question_emb_dim = 32
    concept_emb_dim = 16
    hidden_dim = 32
    batch = 8

    key = jax.random.PRNGKey(0)
    kp, ku, kq, kc = jax.random.split(key, 4)

    params = init_params(kp, num_users, user_emb_dim, question_emb_dim,
                         concept_emb_dim, hidden_dim)
    user_ids = jax.random.randint(ku, (batch,), 0, num_users, dtype=jnp.int32)
    question_emb = jax.random.normal(kq, (batch, question_emb_dim),
                                     dtype=jnp.float32)
    concept_emb = jax.random.normal(kc, (batch, concept_emb_dim),
                                    dtype=jnp.float32)

    ref = reference_forward(params, user_ids, question_emb, concept_emb)

    # f32 matmul path: tight check against the pure-JAX reference.
    out_f32 = two_tower_forward(params, user_ids, question_emb, concept_emb,
                                compute_dtype=jnp.float32)
    out_f32 = jax.block_until_ready(out_f32)
    assert out_f32.shape == (batch,)
    assert jnp.allclose(out_f32, ref, atol=1e-4, rtol=1e-4)

    # bf16-MXU default path (f32 accumulation / elementwise): loose check.
    out_bf16 = two_tower_forward(params, user_ids, question_emb, concept_emb)
    out_bf16 = jax.block_until_ready(out_bf16)
    assert out_bf16.shape == (batch,)
    assert jnp.allclose(out_bf16, ref, atol=5e-2, rtol=5e-2)

    print("KERNEL_OK")
</pallas_src>

<mosaic_0001>
module attributes {stable_mosaic.version = 11 : i64} {
  func.func @two_tower_kernel(%arg0: i32, %arg1: memref<8x64xf32, #tpu.memory_space<vmem>>, %arg2: memref<64x32xf32, #tpu.memory_space<vmem>>, %arg3: memref<1x32xf32, #tpu.memory_space<vmem>>, %arg4: memref<32x24xf32, #tpu.memory_space<vmem>>, %arg5: memref<1x24xf32, #tpu.memory_space<vmem>>, %arg6: memref<8x16xf32, #tpu.memory_space<vmem>>, %arg7: memref<16x8xf32, #tpu.memory_space<vmem>>, %arg8: memref<1x8xf32, #tpu.memory_space<vmem>>, %arg9: memref<1x8xf32, #tpu.memory_space<vmem>>, %arg10: memref<1x1xf32, #tpu.memory_space<vmem>>, %arg11: memref<1x1x8xf32, #tpu.memory_space<vmem>>) attributes {dimension_semantics = [#tpu.dimension_semantics<parallel>], iteration_bounds = array<i64: 1>, scalar_prefetch = 0 : i64, scratch_operands = 0 : i64, tpu.core_type = #tpu.core_type<tc>, window_params = [{transform_indices = @transform_0, window_bounds = array<i64: 8, 64>}, {pipeline_mode = #tpu.pipeline_mode<synchronous>, transform_indices = @transform_1, window_bounds = array<i64: 64, 32>}, {pipeline_mode = #tpu.pipeline_mode<synchronous>, transform_indices = @transform_2, window_bounds = array<i64: 1, 32>}, {pipeline_mode = #tpu.pipeline_mode<synchronous>, transform_indices = @transform_3, window_bounds = array<i64: 32, 24>}, {pipeline_mode = #tpu.pipeline_mode<synchronous>, transform_indices = @transform_4, window_bounds = array<i64: 1, 24>}, {pipeline_mode = #tpu.pipeline_mode<synchronous>, transform_indices = @transform_5, window_bounds = array<i64: 8, 16>}, {pipeline_mode = #tpu.pipeline_mode<synchronous>, transform_indices = @transform_6, window_bounds = array<i64: 16, 8>}, {pipeline_mode = #tpu.pipeline_mode<synchronous>, transform_indices = @transform_7, window_bounds = array<i64: 1, 8>}, {pipeline_mode = #tpu.pipeline_mode<synchronous>, transform_indices = @transform_8, window_bounds = array<i64: 1, 8>}, {pipeline_mode = #tpu.pipeline_mode<synchronous>, transform_indices = @transform_9, window_bounds = array<i64: 1, 1>}, {transform_indices = @transform_10, window_bounds = array<i64: 1, 1, 8>}]} {
    %c0 = arith.constant 0 : index
    %c0_0 = arith.constant 0 : index
    %0 = vector.load %arg1[%c0, %c0_0] : memref<8x64xf32, #tpu.memory_space<vmem>>, vector<8x64xf32>
    %c0_1 = arith.constant 0 : index
    %c0_2 = arith.constant 0 : index
    %1 = vector.load %arg2[%c0_1, %c0_2] : memref<64x32xf32, #tpu.memory_space<vmem>>, vector<64x32xf32>
    %cst = arith.constant dense<0.000000e+00> : vector<8x32xf32>
    %2 = tpu.matmul %0, %1, %cst {dimension_numbers = #tpu.dot_dimension_numbers<[1], [0], [0], [1], [0, 0, 1, 1], [], []>} : vector<8x64xf32>, vector<64x32xf32>, vector<8x32xf32> -> vector<8x32xf32>
    %c0_3 = arith.constant 0 : index
    %c0_4 = arith.constant 0 : index
    %3 = vector.load %arg3[%c0_3, %c0_4] : memref<1x32xf32, #tpu.memory_space<vmem>>, vector<1x32xf32>
    %4 = vector.broadcast %3 : vector<1x32xf32> to vector<8x32xf32>
    %5 = arith.addf %2, %4 : vector<8x32xf32>
    %cst_5 = arith.constant 0.000000e+00 : f32
    %6 = vector.broadcast %cst_5 : f32 to vector<8x32xf32>
    %7 = arith.maximumf %5, %6 : vector<8x32xf32>
    %c0_6 = arith.constant 0 : index
    %c0_7 = arith.constant 0 : index
    %8 = vector.load %arg4[%c0_6, %c0_7] : memref<32x24xf32, #tpu.memory_space<vmem>>, vector<32x24xf32>
    %cst_8 = arith.constant dense<0.000000e+00> : vector<8x24xf32>
    %9 = tpu.matmul %7, %8, %cst_8 {dimension_numbers = #tpu.dot_dimension_numbers<[1], [0], [0], [1], [0, 0, 1, 1], [], []>} : vector<8x32xf32>, vector<32x24xf32>, vector<8x24xf32> -> vector<8x24xf32>
    %c0_9 = arith.constant 0 : index
    %c0_10 = arith.constant 0 : index
    %10 = vector.load %arg5[%c0_9, %c0_10] : memref<1x24xf32, #tpu.memory_space<vmem>>, vector<1x24xf32>
    %11 = vector.broadcast %10 : vector<1x24xf32> to vector<8x24xf32>
    %12 = arith.addf %9, %11 : vector<8x24xf32>
    %13 = vector.extract_strided_slice %12 {offsets = [0, 16], sizes = [8, 8], strides = [1, 1]} : vector<8x24xf32> to vector<8x8xf32>
    %cst_11 = arith.constant 0.000000e+00 : f32
    %14 = vector.broadcast %cst_11 : f32 to vector<8x8xf32>
    %15 = arith.maximumf %13, %14 : vector<8x8xf32>
    %16 = vector.extract_strided_slice %12 {offsets = [0, 0], sizes = [8, 16], strides = [1, 1]} : vector<8x24xf32> to vector<8x16xf32>
    %c0_12 = arith.constant 0 : index
    %c0_13 = arith.constant 0 : index
    %17 = vector.load %arg6[%c0_12, %c0_13] : memref<8x16xf32, #tpu.memory_space<vmem>>, vector<8x16xf32>
    %cst_14 = arith.constant dense<0.000000e+00> : vector<8x16xf32>
    %18 = tpu.matmul %15, %17, %cst_14 {dimension_numbers = #tpu.dot_dimension_numbers<[1], [0], [0], [1], [0, 0, 1, 1], [], []>} : vector<8x8xf32>, vector<8x16xf32>, vector<8x16xf32> -> vector<8x16xf32>
    %19 = arith.addf %16, %18 : vector<8x16xf32>
    %cst_15 = arith.constant 0.000000e+00 : f32
    %20 = vector.broadcast %cst_15 : f32 to vector<8x16xf32>
    %21 = arith.maximumf %19, %20 : vector<8x16xf32>
    %c0_16 = arith.constant 0 : index
    %c0_17 = arith.constant 0 : index
    %22 = vector.load %arg7[%c0_16, %c0_17] : memref<16x8xf32, #tpu.memory_space<vmem>>, vector<16x8xf32>
    %cst_18 = arith.constant dense<0.000000e+00> : vector<8x8xf32>
    %23 = tpu.matmul %21, %22, %cst_18 {dimension_numbers = #tpu.dot_dimension_numbers<[1], [0], [0], [1], [0, 0, 1, 1], [], []>} : vector<8x16xf32>, vector<16x8xf32>, vector<8x8xf32> -> vector<8x8xf32>
    %c0_19 = arith.constant 0 : index
    %c0_20 = arith.constant 0 : index
    %24 = vector.load %arg8[%c0_19, %c0_20] : memref<1x8xf32, #tpu.memory_space<vmem>>, vector<1x8xf32>
    %25 = vector.broadcast %24 : vector<1x8xf32> to vector<8x8xf32>
    %26 = arith.addf %23, %25 : vector<8x8xf32>
    %cst_21 = arith.constant 0.000000e+00 : f32
    %27 = vector.broadcast %cst_21 : f32 to vector<8x8xf32>
    %28 = arith.maximumf %26, %27 : vector<8x8xf32>
    %c0_22 = arith.constant 0 : index
    %c0_23 = arith.constant 0 : index
    %29 = vector.load %arg9[%c0_22, %c0_23] : memref<1x8xf32, #tpu.memory_space<vmem>>, vector<1x8xf32>
    %cst_24 = arith.constant dense<0.000000e+00> : vector<1x8xf32>
    %30 = tpu.matmul %29, %28, %cst_24 {dimension_numbers = #tpu.dot_dimension_numbers<[1], [1], [0], [0], [0, 0, 1, 0], [], []>} : vector<1x8xf32>, vector<8x8xf32>, vector<1x8xf32> -> vector<1x8xf32>
    %c0_25 = arith.constant 0 : index
    %c0_26 = arith.constant 0 : index
    %31 = vector.load %arg10[%c0_25, %c0_26] : memref<1x1xf32, #tpu.memory_space<vmem>>, vector<1x1xf32>
    %32 = vector.broadcast %31 : vector<1x1xf32> to vector<1x8xf32>
    %33 = arith.addf %30, %32 : vector<1x8xf32>
    %c0_27 = arith.constant 0 : index
    %c0_28 = arith.constant 0 : index
    %c0_29 = arith.constant 0 : index
    %34 = vector.load %arg11[%c0_27, %c0_28, %c0_29] : memref<1x1x8xf32, #tpu.memory_space<vmem>>, vector<1x1x8xf32>
    %35 = vector.shape_cast %34 : vector<1x1x8xf32> to vector<1x8xf32>
    %36 = vector.shape_cast %33 : vector<1x8xf32> to vector<1x1x8xf32>
    tpu.vector_store %arg11[%c0_27, %c0_28, %c0_29], %36 {strides = array<i32>} : memref<1x1x8xf32, #tpu.memory_space<vmem>>, vector<1x1x8xf32>,
    return
  }
  func.func @transform_0(%arg0: i32) -> (i32, i32) {
    %c0_i32 = arith.constant 0 : i32
    %c0_i32_0 = arith.constant 0 : i32
    return %arg0, %c0_i32 : i32, i32
  }
  func.func @transform_1(%arg0: i32) -> (i32, i32) {
    %c0_i32 = arith.constant 0 : i32
    %c0_i32_0 = arith.constant 0 : i32
    %c0_i32_1 = arith.constant 0 : i32
    return %c0_i32, %c0_i32_0 : i32, i32
  }
  func.func @transform_2(%arg0: i32) -> (i32, i32) {
    %c0_i32 = arith.constant 0 : i32
    %c0_i32_0 = arith.constant 0 : i32
    %c0_i32_1 = arith.constant 0 : i32
    return %c0_i32, %c0_i32_0 : i32, i32
  }
  func.func @transform_3(%arg0: i32) -> (i32, i32) {
    %c0_i32 = arith.constant 0 : i32
    %c0_i32_0 = arith.constant 0 : i32
    %c0_i32_1 = arith.constant 0 : i32
    return %c0_i32, %c0_i32_0 : i32, i32
  }
  func.func @transform_4(%arg0: i32) -> (i32, i32) {
    %c0_i32 = arith.constant 0 : i32
    %c0_i32_0 = arith.constant 0 : i32
    %c0_i32_1 = arith.constant 0 : i32
    return %c0_i32, %c0_i32_0 : i32, i32
  }
  func.func @transform_5(%arg0: i32) -> (i32, i32) {
    %c0_i32 = arith.constant 0 : i32
    %c0_i32_0 = arith.constant 0 : i32
    %c0_i32_1 = arith.constant 0 : i32
    return %c0_i32, %c0_i32_0 : i32, i32
  }
  func.func @transform_6(%arg0: i32) -> (i32, i32) {
    %c0_i32 = arith.constant 0 : i32
    %c0_i32_0 = arith.constant 0 : i32
    %c0_i32_1 = arith.constant 0 : i32
    return %c0_i32, %c0_i32_0 : i32, i32
  }
  func.func @transform_7(%arg0: i32) -> (i32, i32) {
    %c0_i32 = arith.constant 0 : i32
    %c0_i32_0 = arith.constant 0 : i32
    %c0_i32_1 = arith.constant 0 : i32
    return %c0_i32, %c0_i32_0 : i32, i32
  }
  func.func @transform_8(%arg0: i32) -> (i32, i32) {
    %c0_i32 = arith.constant 0 : i32
    %c0_i32_0 = arith.constant 0 : i32
    %c0_i32_1 = arith.constant 0 : i32
    return %c0_i32, %c0_i32_0 : i32, i32
  }
  func.func @transform_9(%arg0: i32) -> (i32, i32) {
    %c0_i32 = arith.constant 0 : i32
    %c0_i32_0 = arith.constant 0 : i32
    %c0_i32_1 = arith.constant 0 : i32
    return %c0_i32, %c0_i32_0 : i32, i32
  }
  func.func @transform_10(%arg0: i32) -> (i32, i32, i32) {
    %c0_i32 = arith.constant 0 : i32
    %c0_i32_0 = arith.constant 0 : i32
    %c0_i32_1 = arith.constant 0 : i32
    return %arg0, %c0_i32, %c0_i32_0 : i32, i32, i32
  }
}

</mosaic_0001>

<bundles_post_ra>
// kernel: tpu_custom_call.1
= control target key start
LH: loop header
LB: loop body
LE: loop exit
PB: predicated region body
PF: predicated region fallthrough
CT: control target
= control target key end

     0   :  { %s387_s0 = inlined_call_operand.vmem [shape: f32[8,64], index: 0, kind: input, shape index: {}]   ;;  %s388_s1 = inlined_call_operand.vmem [shape: f32[64,32], index: 1, kind: input, shape index: {}]   ;;  %s389_s2 = inlined_call_operand.vmem [shape: f32[1,32], index: 2, kind: input, shape index: {}]   ;;  %s390_s3 = inlined_call_operand.vmem [shape: f32[32,24], index: 3, kind: input, shape index: {}]   ;;  %s391_s4 = inlined_call_operand.vmem [shape: f32[1,24], index: 4, kind: input, shape index: {}]   ;;  %s392_s5 = inlined_call_operand.vmem [shape: f32[8,16], index: 5, kind: input, shape index: {}]   ;;  %s393_s6 = inlined_call_operand.vmem [shape: f32[16,8], index: 6, kind: input, shape index: {}]   ;;  %s394_s7 = inlined_call_operand.vmem [shape: f32[1,8], index: 7, kind: input, shape index: {}]   ;;  %s395_s8 = inlined_call_operand.vmem [shape: f32[1,8], index: 8, kind: input, shape index: {}]   ;;  %s396_s9 = inlined_call_operand.<no memory space> [shape: f32[1,1], index: 9, kind: input, shape index: {}]   ;;  %s397_s10 = inlined_call_operand.hbm [shape: f32[1,1,8], index: 10, kind: output, shape index: {}]  }
   0x1   :  { %v15_v0 = vstv %s396_s9 }
   0x2   :  { %16 = vst [vmem:[#allocation2] sm:$0x1] %v15_v0 }
   0x3   :  { %v46_v1 = vld [vmem:[%s388_s1 + $0x38] sm:$0xff]  ;;  %v45_v2 = vld [vmem:[%s388_s1 + $0x30] sm:$0xff]  ;;  %v44_v3 = vld [vmem:[%s388_s1 + $0x28] sm:$0xff] }
   0x4   :  { %63 = vmatpush.msra.mxu0 %v46_v1  ;;  %v43_v4 = vld [vmem:[%s388_s1 + $0x20] sm:$0xff]  ;;  %v79_v5 = vld [vmem:[%s390_s3 + $0x18] sm:$0xff] }
   0x5   :  { %100 = vmatpush.msra.mxu1 %v79_v5 }
   0x6   :  { %64 = vmatpush.msra.mxu0 %v45_v2 }
   0x7   :  { %17 = vsyncpa [#allocation4], 0  ;;  %v42_v6 = vld [vmem:[%s388_s1 + $0x18] sm:$0xff]  ;;  %v41_v7 = vld [vmem:[%s388_s1 + $0x10] sm:$0xff]  ;;  %vm51_vm0 = vcmask 523264   ;;  %vm84_vm1 = vcmask 261120  }
   0x8   :  { %65 = vmatpush.msra.mxu0 %v44_v3  ;;  %v40_v8 = vld [vmem:[%s388_s1 + $0x8] sm:$0xff]  ;;  %v39_v9 = vld [vmem:[%s388_s1] sm:$0xff]  ;;  %v78_v11 = vld [vmem:[%s390_s3 + $0x10] sm:$0xff]  ;;  %vm113_vm2 = vcmask 64512   ;;  %vm144_vm3 = vcmask 130048   ;;  %v261_v30 = vmov 0  }
   0x9   :  { %v38_v10 = vld [vmem:[%s387_s0] sm:$0xff]  ;;  %101 = vmatpush.msra.mxu1 %v78_v11  ;;  %v77_v12 = vld [vmem:[%s390_s3 + $0x8] sm:$0xff]  ;;  %230 = vset.pattern.permute.xlu0 %v261_v30  ;;  %s262_s27 = smov [#allocation3]   ;;  %s212_s11 = sshll.u32 %s397_s10, 4  ;;  %vm203_vm4 = vcmask 57344   ;;  %s213_s11 = int_to_ptr.hbm [resolvable:$true] %s212_s11 }
   0xa   :  { %66 = vmatpush.msra.mxu0 %v43_v4  ;;  %v76_v13 = vld [vmem:[%s390_s3] sm:$0xff]  ;;  %s260_s3 = smov 112   ;;  %v139_v24 = vld [vmem:[%s393_s6 + $0x8] sm:$0xff]  ;;  %s210_s28 = sshll.u32 %s262_s27, 4  ;;  %s211_s28 = int_to_ptr.vmem [resolvable:$true] %s210_s28 }
   0xb   :  { %102 = vmatpush.msra.mxu1 %v77_v12  ;;  %v231_v14 = vld [vmem:[%s389_s2] ss:$0 sm:$0xff]  ;;  %162 = vmatpush.msra.mxu3 %v139_v24 }
   0xc   :  { %67 = vmatpush.msra.mxu0 %v42_v6  ;;  %v109_v18 = vld [vmem:[%s392_s5] sm:$0xff] }
   0xd   :  { %103 = vmatpush.msra.mxu1 %v76_v13  ;;  %131 = vmatpush.msra.mxu2 %v109_v18  ;;  %v232_v19 = vld [vmem:[%s391_s4] ss:$0 sm:$0xff] }
   0xe   :  { %68 = vmatpush.msra.mxu0 %v41_v7  ;;  %v138_v25 = vld [vmem:[%s393_s6] sm:$0xff] }
   0xf   :  { %163 = vmatpush.msra.mxu3 %v138_v25  ;;  %v170_v29 = vld [vmem:[#allocation2] sm:$0x1] }
  0x10   :  { %69 = vmatpush.msra.mxu0 %v40_v8  ;;  %v233_v31 = vld [vmem:[%s394_s7] ss:$0 sm:$0xff] }
  0x11   :  { %v169_v35 = vld [vmem:[%s395_s8] sm:$0x1] }
  0x12   :  { %70 = vmatpush.msra.mxu0 %v39_v9 }
  0x13   :  { %221 = vmatmul.msk.f32.vlgmr.msra.gmra.mxu0 %vm51_vm0, %v38_v10 }
  0x90   :  { %v72_v15 = vpop.f32.mrf.mxu0 }
  0x91   :  { %v73_v16 = vadd.f32 %v231_v14, %v72_v15 }
  0x93   :  { %v75_v17 = vmax.f32 %v73_v16, 0.0 }
  0x95   :  { %222 = vmatmul.msk.f32.vlgmr.msra.gmra.mxu1 %vm84_vm1, %v75_v17 }
 0x112   :  { %v105_v20 = vpop.f32.mrf.mxu1 }
 0x113   :  { %v106_v21 = vadd.f32 %v232_v19, %v105_v20 }
 0x115   :  { %v108_v22 = vmax.f32 %v106_v21, 0.0 }
 0x117   :  { %111 = vrot.lane.b32.xlu0 %v108_v22, %s260_s3 }
 0x11f   :  { %173 = vperm.xlu0 %230, %v170_v29  }
 0x189   :  { %v112_v23 = vpop.permute.xlu0 %111 }
 0x18a   :  { %223 = vmatmul.msk.f32.vlgmr.msra.gmra.mxu2 %vm113_vm2, %v112_v23 }
 0x191   :  { %v174_v36 = vpop.permute.xlu0 %173 }
 0x192   :  { %v176_v37 = vperm.slane %v174_v36, 0 }
 0x20d   :  { %v133_v26 = vpop.f32.mrf.mxu2 }
 0x20e   :  { %v136_v27 = vadd.f32 %v133_v26, %v106_v21 }
 0x210   :  { %v137_v28 = vmax.f32 %v136_v27, 0.0 }
 0x212   :  { %224 = vmatmul.msk.f32.vlgmr.msra.gmra.mxu3 %vm144_vm3, %v137_v28 }
 0x295   :  { %v165_v32 = vpop.f32.mrf.mxu3 }
 0x296   :  { %v166_v33 = vadd.f32 %v233_v31, %v165_v32 }
 0x298   :  { %v168_v34 = vmax.f32 %v166_v33, 0.0 }
 0x29a   :  { %225 = vmatpush.xpose.msk.msrb.mxu2 %vm113_vm2, %v168_v34 }
 0x29d   :  { %226 = vmatmul.msk.f32.vlgmr.msrb.gmra.mxu2 %vm113_vm2, %v169_v35 }
 0x320   :  { %v200_v38 = vpop.f32.mrf.mxu2 }
 0x321   :  { %v201_v39 = vadd.f32 %v200_v38, %v176_v37 }
 0x323   :  { %204 = vst.msk [vmem:[#allocation3] sm:$0x1] %vm203_vm4, %v201_v39 }
 0x324   :  { %215 = dma.vmem_to_hbm [thread:$0]  %s211_s28, 16, %s213_s11, [#allocation4]  }
 0x325   :  { %258 = dma.done.wait [#allocation4], 16  }
 0x326   :  { %259 = vsyncadd [#allocation4], 4294967280 }
 0x327   :  { %220 = vsyncpa [#allocation4], 1 }

</bundles_post_ra>
